<compile_context>
chip_gen: v5e
topology: v5e:2x2
jax: 0.10.0
libtpu: 0.0.40
codegen_flags: <defaults>
</compile_context>

<pallas_src>
import jax
import jax.numpy as jnp
from jax.experimental import pallas as pl
from jax.experimental.pallas import tpu as pltpu


def _dense_block4_kernel(x_ref, scale_ref, bias_ref, w_ref, b_ref,
                         act_ref, probs_ref):
    # x_ref:      (bn, HW, C)  feature-map block, channels on the 128-lane axis
    # scale/bias: (1, C)       folded BN scale / bias (constant index_map, VMEM-resident)
    # w_ref:      (C, K)       classifier weight (transposed torch layout, pre-scaled by 1/HW)
    # b_ref:      (1, K)       classifier bias
    # act_ref:    (bn, HW, C)  post-ReLU activations (== self.activations), bf16
    # probs_ref:  (bn, K)      sigmoid(classifier logits)
    x = x_ref[...].astype(jnp.float32)
    y = jnp.maximum(x * scale_ref[...] + bias_ref[...], 0.0)        # fused BN + ReLU (VPU)
    act_ref[...] = y.astype(act_ref.dtype)                          # bf16 pack only at the store
    pooled = jnp.sum(y, axis=1)                                     # (bn, C); 1/HW folded into w
    logits = jnp.dot(pooled, w_ref[...],
                     preferred_element_type=jnp.float32) + b_ref[...]
    probs_ref[...] = jax.nn.sigmoid(logits).astype(probs_ref.dtype)


def _choose_block_batch(n, cap=32):
    """Samples per grid step.  bn must be a multiple of 8 (sublane-legal
    (bn, K) probs block) or the full batch.  Prefer >=4 grid steps (software
    pipeline depth + both v7x TensorCores busy), then >=2, then the largest
    legal block."""
    cands = [d for d in range(8, min(cap, n) + 1, 8) if n % d == 0]
    for min_steps in (4, 2, 1):
        ok = [d for d in cands if n // d >= min_steps]
        if ok:
            return max(ok)
    return n   # full batch in one block (second-to-last dim == full array dim: legal)


def dense_block4_forward(x_nhwc, bn_gamma, bn_beta, bn_mean, bn_var, w, b,
                         eps=1e-5, act_dtype=jnp.bfloat16):
    """Fused BN -> ReLU -> global-avg-pool -> Linear -> Sigmoid.

    x_nhwc: (N, H, W, C) feature map (DenseNet backbone output, NHWC so no
            relayout is needed on either side of the kernel).
    w: (K, C) torch-Linear-style classifier weight, b: (K,).
    Returns (class probabilities (N, K) f32,
             post-ReLU activations (N, H, W, C) in act_dtype -- Grad-CAM's
             self.activations, kept in NHWC)."""
    N, H, W_, C = x_nhwc.shape
    HW = H * W_
    K = w.shape[0]

    # Fold BN running stats into per-channel scale/bias (parameter glue, plain JAX).
    scale = bn_gamma.astype(jnp.float32) / jnp.sqrt(bn_var.astype(jnp.float32) + eps)
    bias = bn_beta.astype(jnp.float32) - bn_mean.astype(jnp.float32) * scale
    scale = scale.reshape(1, C)
    bias = bias.reshape(1, C)

    # Classifier weight: (K, C) -> (C, K), with the 1/HW of the average pool
    # folded in so the kernel can use a plain sum reduction.
    w_t = jnp.transpose(w).astype(jnp.float32) * (1.0 / HW)
    b2 = b.reshape(1, K).astype(jnp.float32)

    # Flatten spatial dims: (N, HW, C) -- free reshape, channels on the lane axis.
    x3 = x_nhwc.reshape(N, HW, C)

    bn_blk = _choose_block_batch(N)
    grid = (N // bn_blk,)

    x_bytes = x3.dtype.itemsize
    act_bytes = jnp.dtype(act_dtype).itemsize
    cost = pl.CostEstimate(
        flops=3 * N * HW * C + 2 * N * C * K,
        transcendentals=N * K,                                   # sigmoid
        bytes_accessed=(N * HW * C * (x_bytes + act_bytes)       # x read + act write
                        + (2 * C + C * K + K) * 4                # params
                        + N * K * 4),                            # probs
    )

    act3, probs = pl.pallas_call(
        _dense_block4_kernel,
        out_shape=(
            jax.ShapeDtypeStruct((N, HW, C), act_dtype),
            jax.ShapeDtypeStruct((N, K), jnp.float32),
        ),
        grid=grid,
        in_specs=[
            pl.BlockSpec((bn_blk, HW, C), lambda n: (n, 0, 0)),
            # Constant-index-map params: DMA'd once, VMEM-resident across the grid.
            pl.BlockSpec((1, C), lambda n: (0, 0)),
            pl.BlockSpec((1, C), lambda n: (0, 0)),
            pl.BlockSpec((C, K), lambda n: (0, 0)),
            pl.BlockSpec((1, K), lambda n: (0, 0)),
        ],
        out_specs=(
            pl.BlockSpec((bn_blk, HW, C), lambda n: (n, 0, 0)),
            pl.BlockSpec((bn_blk, K), lambda n: (n, 0)),
        ),
        compiler_params=pltpu.CompilerParams(
            dimension_semantics=("parallel",),
            vmem_limit_bytes=32 * 1024 * 1024,
        ),
        cost_estimate=cost,
    )(x3, scale, bias, w_t, b2)

    return probs, act3.reshape(N, H, W_, C)


if __name__ == "__main__":
    # Small shapes consistent with the module's tail (real DenseNet121: C=1024, 7x7, K=14).
    N, C, H, W, K = 2, 32, 8, 8, 14

    key = jax.random.PRNGKey(0)
    kx, kg, kb, km, kv, kw, kbias = jax.random.split(key, 7)
    x_nhwc = jax.random.normal(kx, (N, H, W, C), jnp.float32)       # backbone output, NHWC
    gamma = 0.5 + jax.random.uniform(kg, (C,), jnp.float32)          # bn weight
    beta = 0.1 * jax.random.normal(kb, (C,), jnp.float32)            # bn bias
    running_mean = 0.1 * jax.random.normal(km, (C,), jnp.float32)
    running_var = 0.5 + jax.random.uniform(kv, (C,), jnp.float32)
    w = 0.05 * jax.random.normal(kw, (K, C), jnp.float32)            # classifier weight
    b = 0.01 * jax.random.normal(kbias, (K,), jnp.float32)           # classifier bias

    probs, acts = dense_block4_forward(x_nhwc, gamma, beta, running_mean,
                                       running_var, w, b)
    probs, acts = jax.block_until_ready((probs, acts))

    # Pure-JAX reference (NHWC) for correctness.
    eps = 1e-5
    y_ref = jnp.maximum(
        (x_nhwc - running_mean) / jnp.sqrt(running_var + eps) * gamma + beta, 0.0)
    p_ref = y_ref.mean(axis=(1, 2))
    probs_ref = jax.nn.sigmoid(p_ref @ w.T + b)

    assert probs.shape == (N, K) and acts.shape == (N, H, W, C)
    assert acts.dtype == jnp.bfloat16
    # Activations are stored in bf16 (compute stays f32) -> bf16-level tolerance.
    assert jnp.allclose(acts.astype(jnp.float32), y_ref, atol=2e-2, rtol=2e-2)
    # Probabilities are computed from the f32 path -> tight tolerance.
    assert jnp.allclose(probs, probs_ref, atol=1e-5, rtol=1e-5)
    print("KERNEL_OK")
</pallas_src>

<mosaic_0001>
module attributes {stable_mosaic.version = 11 : i64} {
  func.func @_dense_block4_kernel(%arg0: i32, %arg1: memref<2x64x32xf32, #tpu.memory_space<vmem>>, %arg2: memref<1x32xf32, #tpu.memory_space<vmem>>, %arg3: memref<1x32xf32, #tpu.memory_space<vmem>>, %arg4: memref<32x14xf32, #tpu.memory_space<vmem>>, %arg5: memref<1x14xf32, #tpu.memory_space<vmem>>, %arg6: memref<2x64x32xbf16, #tpu.memory_space<vmem>>, %arg7: memref<2x14xf32, #tpu.memory_space<vmem>>) attributes {dimension_semantics = [#tpu.dimension_semantics<parallel>], iteration_bounds = array<i64: 1>, scalar_prefetch = 0 : i64, scratch_operands = 0 : i64, tpu.core_type = #tpu.core_type<tc>, window_params = [{transform_indices = @transform_0, window_bounds = array<i64: 2, 64, 32>}, {pipeline_mode = #tpu.pipeline_mode<synchronous>, transform_indices = @transform_1, window_bounds = array<i64: 1, 32>}, {pipeline_mode = #tpu.pipeline_mode<synchronous>, transform_indices = @transform_2, window_bounds = array<i64: 1, 32>}, {pipeline_mode = #tpu.pipeline_mode<synchronous>, transform_indices = @transform_3, window_bounds = array<i64: 32, 14>}, {pipeline_mode = #tpu.pipeline_mode<synchronous>, transform_indices = @transform_4, window_bounds = array<i64: 1, 14>}, {transform_indices = @transform_5, window_bounds = array<i64: 2, 64, 32>}, {transform_indices = @transform_6, window_bounds = array<i64: 2, 14>}]} {
    %c0 = arith.constant 0 : index
    %c0_0 = arith.constant 0 : index
    %c0_1 = arith.constant 0 : index
    %0 = vector.load %arg1[%c0, %c0_0, %c0_1] : memref<2x64x32xf32, #tpu.memory_space<vmem>>, vector<2x64x32xf32>
    %c0_2 = arith.constant 0 : index
    %c0_3 = arith.constant 0 : index
    %1 = vector.load %arg2[%c0_2, %c0_3] : memref<1x32xf32, #tpu.memory_space<vmem>>, vector<1x32xf32>
    %2 = vector.shape_cast %1 : vector<1x32xf32> to vector<1x1x32xf32>
    %3 = vector.broadcast %2 : vector<1x1x32xf32> to vector<2x64x32xf32>
    %4 = arith.mulf %0, %3 : vector<2x64x32xf32>
    %c0_4 = arith.constant 0 : index
    %c0_5 = arith.constant 0 : index
    %5 = vector.load %arg3[%c0_4, %c0_5] : memref<1x32xf32, #tpu.memory_space<vmem>>, vector<1x32xf32>
    %6 = vector.shape_cast %5 : vector<1x32xf32> to vector<1x1x32xf32>
    %7 = vector.broadcast %6 : vector<1x1x32xf32> to vector<2x64x32xf32>
    %8 = arith.addf %4, %7 : vector<2x64x32xf32>
    %cst = arith.constant 0.000000e+00 : f32
    %9 = vector.broadcast %cst : f32 to vector<2x64x32xf32>
    %10 = arith.maximumf %8, %9 : vector<2x64x32xf32>
    %11 = arith.truncf %10 : vector<2x64x32xf32> to vector<2x64x32xbf16>
    %c0_6 = arith.constant 0 : index
    %c0_7 = arith.constant 0 : index
    %c0_8 = arith.constant 0 : index
    %12 = vector.load %arg6[%c0_6, %c0_7, %c0_8] : memref<2x64x32xbf16, #tpu.memory_space<vmem>>, vector<2x64x32xbf16>
    tpu.vector_store %arg6[%c0_6, %c0_7, %c0_8], %11 {strides = array<i32>} : memref<2x64x32xbf16, #tpu.memory_space<vmem>>, vector<2x64x32xbf16>,
    %cst_9 = arith.constant dense<0.000000e+00> : vector<2x32xf32>
    %13 = vector.multi_reduction <add>, %10, %cst_9 [1] : vector<2x64x32xf32> to vector<2x32xf32>
    %c0_10 = arith.constant 0 : index
    %c0_11 = arith.constant 0 : index
    %14 = vector.load %arg4[%c0_10, %c0_11] : memref<32x14xf32, #tpu.memory_space<vmem>>, vector<32x14xf32>
    %cst_12 = arith.constant dense<0.000000e+00> : vector<2x14xf32>
    %15 = tpu.matmul %13, %14, %cst_12 {dimension_numbers = #tpu.dot_dimension_numbers<[1], [0], [0], [1], [0, 0, 1, 1], [], []>} : vector<2x32xf32>, vector<32x14xf32>, vector<2x14xf32> -> vector<2x14xf32>
    %c0_13 = arith.constant 0 : index
    %c0_14 = arith.constant 0 : index
    %16 = vector.load %arg5[%c0_13, %c0_14] : memref<1x14xf32, #tpu.memory_space<vmem>>, vector<1x14xf32>
    %17 = vector.broadcast %16 : vector<1x14xf32> to vector<2x14xf32>
    %18 = arith.addf %15, %17 : vector<2x14xf32>
    %19 = arith.negf %18 : vector<2x14xf32>
    %20 = math.exp %19 : vector<2x14xf32>
    %cst_15 = arith.constant 1.000000e+00 : f32
    %21 = vector.broadcast %cst_15 : f32 to vector<2x14xf32>
    %22 = arith.addf %21, %20 : vector<2x14xf32>
    %23 = arith.divf %21, %22 : vector<2x14xf32>
    %c0_16 = arith.constant 0 : index
    %c0_17 = arith.constant 0 : index
    %24 = vector.load %arg7[%c0_16, %c0_17] : memref<2x14xf32, #tpu.memory_space<vmem>>, vector<2x14xf32>
    tpu.vector_store %arg7[%c0_16, %c0_17], %23 {strides = array<i32>} : memref<2x14xf32, #tpu.memory_space<vmem>>, vector<2x14xf32>,
    return
  }
  func.func @transform_0(%arg0: i32) -> (i32, i32, i32) {
    %c0_i32 = arith.constant 0 : i32
    %c0_i32_0 = arith.constant 0 : i32
    %c0_i32_1 = arith.constant 0 : i32
    return %arg0, %c0_i32, %c0_i32_0 : i32, i32, i32
  }
  func.func @transform_1(%arg0: i32) -> (i32, i32) {
    %c0_i32 = arith.constant 0 : i32
    %c0_i32_0 = arith.constant 0 : i32
    %c0_i32_1 = arith.constant 0 : i32
    return %c0_i32, %c0_i32_0 : i32, i32
  }
  func.func @transform_2(%arg0: i32) -> (i32, i32) {
    %c0_i32 = arith.constant 0 : i32
    %c0_i32_0 = arith.constant 0 : i32
    %c0_i32_1 = arith.constant 0 : i32
    return %c0_i32, %c0_i32_0 : i32, i32
  }
  func.func @transform_3(%arg0: i32) -> (i32, i32) {
    %c0_i32 = arith.constant 0 : i32
    %c0_i32_0 = arith.constant 0 : i32
    %c0_i32_1 = arith.constant 0 : i32
    return %c0_i32, %c0_i32_0 : i32, i32
  }
  func.func @transform_4(%arg0: i32) -> (i32, i32) {
    %c0_i32 = arith.constant 0 : i32
    %c0_i32_0 = arith.constant 0 : i32
    %c0_i32_1 = arith.constant 0 : i32
    return %c0_i32, %c0_i32_0 : i32, i32
  }
  func.func @transform_5(%arg0: i32) -> (i32, i32, i32) {
    %c0_i32 = arith.constant 0 : i32
    %c0_i32_0 = arith.constant 0 : i32
    %c0_i32_1 = arith.constant 0 : i32
    return %arg0, %c0_i32, %c0_i32_0 : i32, i32, i32
  }
  func.func @transform_6(%arg0: i32) -> (i32, i32) {
    %c0_i32 = arith.constant 0 : i32
    %c0_i32_0 = arith.constant 0 : i32
    return %arg0, %c0_i32 : i32, i32
  }
}

</mosaic_0001>

<bundles_post_ra>
// kernel: tpu_custom_call.1
= control target key start
LH: loop header
LB: loop body
LE: loop exit
PB: predicated region body
PF: predicated region fallthrough
CT: control target
= control target key end

     0   :  { %s489_s0 = inlined_call_operand.vmem [shape: f32[2,64,32], index: 0, kind: input, shape index: {}]   ;;  %s490_s1 = inlined_call_operand.vmem [shape: f32[1,32], index: 1, kind: input, shape index: {}]   ;;  %s491_s2 = inlined_call_operand.vmem [shape: f32[1,32], index: 2, kind: input, shape index: {}]   ;;  %s492_s3 = inlined_call_operand.vmem [shape: f32[32,14], index: 3, kind: input, shape index: {}]   ;;  %s493_s4 = inlined_call_operand.vmem [shape: f32[1,14], index: 4, kind: input, shape index: {}]   ;;  %s494_s5 = inlined_call_operand.vmem [shape: bf16[2,64,32], index: 5, kind: output, shape index: {0}]   ;;  %s495_s6 = inlined_call_operand.hbm [shape: f32[2,14], index: 6, kind: output, shape index: {1}]  }
   0x1   :  { %v174_v0 = vld [vmem:[%s492_s3 + $0x18] sm:$0xff]  ;;  %v173_v1 = vld [vmem:[%s492_s3 + $0x10] sm:$0xff]  ;;  %v172_v2 = vld [vmem:[%s492_s3 + $0x8] sm:$0xff] }
   0x2   :  { %197 = vmatpush.msra.mxu0 %v174_v0  ;;  %v171_v3 = vld [vmem:[%s492_s3] sm:$0xff]  ;;  %v24_v5 = vld [vmem:[%s489_s0 + $0x8] sm:$0xff]  ;;  %v25_v7 = vld [vmem:[%s489_s0 + $0x10] sm:$0xff] }
   0x3   :  { %v23_v4 = vld [vmem:[%s489_s0] sm:$0xff] }
   0x4   :  { %198 = vmatpush.msra.mxu0 %v173_v1  ;;  %v249_v6 = vld [vmem:[%s490_s1] ss:$0 sm:$0xff] }
   0x6   :  { %199 = vmatpush.msra.mxu0 %v172_v2 }
   0x8   :  { %200 = vmatpush.msra.mxu0 %v171_v3 }
   0x9   :  { %12 = vsyncpa [#allocation3], 0  ;;  %v26_v8 = vld [vmem:[%s489_s0 + $0x18] sm:$0xff]  ;;  %v27_v9 = vld [vmem:[%s489_s0 + $0x20] sm:$0xff]  ;;  %v43_v14 = vmul.f32 %v249_v6, %v23_v4  ;;  %v44_v15 = vmul.f32 %v249_v6, %v24_v5  ;;  %v45_v16 = vmul.f32 %v249_v6, %v25_v7  ;;  %vm111_vm0 = vcmask 257024   ;;  %s282_s17 = smov [#allocation2]  }
   0xa   :  { %v28_v10 = vld [vmem:[%s489_s0 + $0x28] sm:$0xff]  ;;  %v29_v11 = vld [vmem:[%s489_s0 + $0x30] sm:$0xff]  ;;  %v31_v12 = vld [vmem:[%s489_s0 + $0x40] sm:$0xff]  ;;  %v46_v19 = vmul.f32 %v249_v6, %v26_v8  ;;  %v47_v23 = vmul.f32 %v249_v6, %v27_v9  ;;  %vm128_vm1 = vcmask 261120   ;;  %vm181_vm2 = vcmask 1041409   ;;  %s233_s18 = sshll.u32 %s282_s17, 4  ;;  %s234_s18 = int_to_ptr.vmem [resolvable:$true] %s233_s18 }
   0xb   :  { %v32_v13 = vld [vmem:[%s489_s0 + $0x48] sm:$0xff]  ;;  %v363_v17 = vld [vmem:[%s491_s2] ss:$0 sm:$0xff]  ;;  %v33_v18 = vld [vmem:[%s489_s0 + $0x50] sm:$0xff]  ;;  %v48_v27 = vmul.f32 %v249_v6, %v28_v10  ;;  %v49_v28 = vmul.f32 %v249_v6, %v29_v11  ;;  %v51_v29 = vmul.f32 %v249_v6, %v31_v12  ;;  %vm224_vm6 = vcmask 107520  }
   0xc   :  { %v30_v20 = vld [vmem:[%s489_s0 + $0x38] sm:$0xff]  ;;  %v35_v22 = vld [vmem:[%s489_s0 + $0x60] sm:$0xff]  ;;  %v36_v24 = vld [vmem:[%s489_s0 + $0x68] sm:$0xff]  ;;  %v52_v30 = vmul.f32 %v249_v6, %v32_v13  ;;  %v53_v31 = vmul.f32 %v249_v6, %v33_v18  ;;  %v63_v32 = vadd.f32 %v363_v17, %v43_v14  ;;  %v64_v33 = vadd.f32 %v363_v17, %v44_v15 }
   0xd   :  { %v34_v21 = vld [vmem:[%s489_s0 + $0x58] sm:$0xff]  ;;  %v37_v25 = vld [vmem:[%s489_s0 + $0x70] sm:$0xff]  ;;  %v65_v34 = vadd.f32 %v363_v17, %v45_v16  ;;  %v50_v35 = vmul.f32 %v249_v6, %v30_v20  ;;  %v55_v37 = vmul.f32 %v249_v6, %v35_v22  ;;  %v66_v38 = vadd.f32 %v363_v17, %v46_v19 }
   0xe   :  { %v38_v26 = vld [vmem:[%s489_s0 + $0x78] sm:$0xff]  ;;  %v54_v36 = vmul.f32 %v249_v6, %v34_v21  ;;  %v56_v39 = vmul.f32 %v249_v6, %v36_v24  ;;  %v57_v40 = vmul.f32 %v249_v6, %v37_v25  ;;  %v67_v42 = vadd.f32 %v363_v17, %v47_v23 }
   0xf   :  { %v58_v41 = vmul.f32 %v249_v6, %v38_v26  ;;  %v68_v43 = vadd.f32 %v363_v17, %v48_v27  ;;  %v69_v44 = vadd.f32 %v363_v17, %v49_v28  ;;  %v71_v45 = vadd.f32 %v363_v17, %v51_v29 }
  0x10   :  { %v72_v46 = vadd.f32 %v363_v17, %v52_v30  ;;  %v73_v47 = vadd.f32 %v363_v17, %v53_v31  ;;  %v79_v48 = vmax.f32 %v63_v32, 0.0  ;;  %v80_v49 = vmax.f32 %v64_v33, 0.0 }
  0x11   :  { %v81_v50 = vmax.f32 %v65_v34, 0.0  ;;  %v70_v51 = vadd.f32 %v363_v17, %v50_v35  ;;  %v74_v52 = vadd.f32 %v363_v17, %v54_v36  ;;  %v75_v53 = vadd.f32 %v363_v17, %v55_v37 }
  0x12   :  { %v82_v54 = vmax.f32 %v66_v38, 0.0  ;;  %v83_v55 = vmax.f32 %v67_v42, 0.0  ;;  %v95_v56 = vpack.c.bf16 %v79_v48, %v79_v48  ;;  %v96_v57 = vpack.c.bf16 %v80_v49, %v80_v49 }
  0x13   :  { %v97_v58 = vpack.c.bf16 %v81_v50, %v81_v50  ;;  %v76_v59 = vadd.f32 %v363_v17, %v56_v39  ;;  %v84_v60 = vmax.f32 %v68_v43, 0.0  ;;  %v85_v61 = vmax.f32 %v69_v44, 0.0 }
  0x14   :  { %v98_v62 = vpack.c.bf16 %v82_v54, %v82_v54  ;;  %v87_v63 = vmax.f32 %v71_v45, 0.0  ;;  %v88_v0 = vmax.f32 %v72_v46, 0.0  ;;  %v89_v1 = vmax.f32 %v73_v47, 0.0  ;;  %112 = vst.msk [vmem:[%s494_s5] sm:$0xf] %vm111_vm0, %v95_v56 }
  0x15   :  { %v99_v2 = vpack.c.bf16 %v83_v55, %v83_v55  ;;  %v77_v3 = vadd.f32 %v363_v17, %v57_v40  ;;  %v86_v4 = vmax.f32 %v70_v51, 0.0  ;;  %v90_v5 = vmax.f32 %v74_v52, 0.0  ;;  %113 = vst.msk [vmem:[%s494_s5 + $0x4] sm:$0xf] %vm111_vm0, %v96_v57 }
  0x16   :  { %v100_v6 = vpack.c.bf16 %v84_v60, %v84_v60  ;;  %v101_v7 = vpack.c.bf16 %v85_v61, %v85_v61  ;;  %114 = vst.msk [vmem:[%s494_s5 + $0x8] sm:$0xf] %vm111_vm0, %v97_v58  ;;  %v129_v8 = vsel %vm128_vm1, %v79_v48, 0.0  ;;  %v130_v9 = vsel %vm128_vm1, %v80_v49, 0.0 }
  0x17   :  { %v132_v10 = vsel %vm128_vm1, %v81_v50, 0.0  ;;  %v91_v11 = vmax.f32 %v75_v53, 0.0  ;;  %v102_v12 = vpack.c.bf16 %v86_v4, %v86_v4  ;;  %v103_v13 = vpack.c.bf16 %v87_v63, %v87_v63  ;;  %115 = vst.msk [vmem:[%s494_s5 + $0xc] sm:$0xf] %vm111_vm0, %v98_v62 }
  0x18   :  { %v131_v14 = vadd.f32 %v130_v9, %v129_v8  ;;  %116 = vst.msk [vmem:[%s494_s5 + $0x10] sm:$0xf] %vm111_vm0, %v99_v2  ;;  %v134_v15 = vsel %vm128_vm1, %v82_v54, 0.0  ;;  %v150_v16 = vsel %vm128_vm1, %v87_v63, 0.0  ;;  %v151_v18 = vsel %vm128_vm1, %v88_v0, 0.0 }
  0x19   :  { %v153_v19 = vsel %vm128_vm1, %v89_v1, 0.0  ;;  %v78_v20 = vadd.f32 %v363_v17, %v58_v41  ;;  %v104_v21 = vpack.c.bf16 %v88_v0, %v88_v0  ;;  %117 = vst.msk [vmem:[%s494_s5 + $0x14] sm:$0xf] %vm111_vm0, %v100_v6  ;;  %v152_v23 = vadd.f32 %v151_v18, %v150_v16 }
  0x1a   :  { %v133_v22 = vadd.f32 %v132_v10, %v131_v14  ;;  %v92_v24 = vmax.f32 %v76_v59, 0.0  ;;  %v105_v25 = vpack.c.bf16 %v89_v1, %v89_v1  ;;  %118 = vst.msk [vmem:[%s494_s5 + $0x18] sm:$0xf] %vm111_vm0, %v101_v7  ;;  %v136_v26 = vsel %vm128_vm1, %v83_v55, 0.0  ;;  %v251_v1 = vld [vmem:[%s493_s4] ss:$0 sm:$0xff] }
  0x1b   :  { %v155_v27 = vsel %vm128_vm1, %v90_v5, 0.0  ;;  %v106_v17 = vpack.c.bf16 %v90_v5, %v90_v5  ;;  %119 = vst.msk [vmem:[%s494_s5 + $0x1c] sm:$0xf] %vm111_vm0, %v102_v12  ;;  %v154_v29 = vadd.f32 %v153_v19, %v152_v23  ;;  %v93_v30 = vmax.f32 %v77_v3, 0.0  ;;  %s235_s4 = sshll.u32 %s495_s6, 4  ;;  %s236_s4 = int_to_ptr.hbm [resolvable:$true] %s235_s4 }
  0x1c   :  { %v135_v28 = vadd.f32 %v134_v15, %v133_v22  ;;  %v107_v31 = vpack.c.bf16 %v91_v11, %v91_v11  ;;  %120 = vst.msk [vmem:[%s494_s5 + $0x20] sm:$0xf] %vm111_vm0, %v103_v13  ;;  %v138_v32 = vsel %vm128_vm1, %v84_v60, 0.0  ;;  %v157_v33 = vsel %vm128_vm1, %v91_v11, 0.0 }
  0x1d   :  { %v94_v34 = vmax.f32 %v78_v20, 0.0  ;;  %v108_v35 = vpack.c.bf16 %v92_v24, %v92_v24  ;;  %121 = vst.msk [vmem:[%s494_s5 + $0x24] sm:$0xf] %vm111_vm0, %v104_v21  ;;  %v156_v37 = vadd.f32 %v155_v27, %v154_v29  ;;  %v109_v38 = vpack.c.bf16 %v93_v30, %v93_v30 }
  0x1e   :  { %v137_v36 = vadd.f32 %v136_v26, %v135_v28  ;;  %122 = vst.msk [vmem:[%s494_s5 + $0x28] sm:$0xf] %vm111_vm0, %v105_v25  ;;  %v140_v39 = vsel %vm128_vm1, %v85_v61, 0.0  ;;  %v159_v40 = vsel %vm128_vm1, %v92_v24, 0.0  ;;  %v142_v44 = vsel %vm128_vm1, %v86_v4, 0.0 }
  0x1f   :  { %v110_v41 = vpack.c.bf16 %v94_v34, %v94_v34  ;;  %123 = vst.msk [vmem:[%s494_s5 + $0x2c] sm:$0xf] %vm111_vm0, %v106_v17  ;;  %v158_v43 = vadd.f32 %v157_v33, %v156_v37  ;;  %v161_v45 = vsel %vm128_vm1, %v93_v30, 0.0  ;;  %v163_v48 = vsel %vm128_vm1, %v94_v34, 0.0 }
  0x20   :  { %v139_v42 = vadd.f32 %v138_v32, %v137_v36  ;;  %124 = vst.msk [vmem:[%s494_s5 + $0x30] sm:$0xf] %vm111_vm0, %v107_v31 }
  0x21   :  { %125 = vst.msk [vmem:[%s494_s5 + $0x34] sm:$0xf] %vm111_vm0, %v108_v35  ;;  %v160_v47 = vadd.f32 %v159_v40, %v158_v43 }
  0x22   :  { %v141_v46 = vadd.f32 %v140_v39, %v139_v42  ;;  %126 = vst.msk [vmem:[%s494_s5 + $0x38] sm:$0xf] %vm111_vm0, %v109_v38 }
  0x23   :  { %127 = vst.msk [vmem:[%s494_s5 + $0x3c] sm:$0xf] %vm111_vm0, %v110_v41  ;;  %v162_v50 = vadd.f32 %v161_v45, %v160_v47 }
  0x24   :  { %v143_v49 = vadd.f32 %v142_v44, %v141_v46 }
  0x25   :  { %v164_v52 = vadd.f32 %v163_v48, %v162_v50 }
  0x26   :  { %v144_v51 = vrot.slane %v143_v49, 4 }
  0x27   :  { %v165_v54 = vrot.slane %v164_v52, 4 }
  0x28   :  { %v145_v53 = vadd.f32 %v144_v51, %v143_v49 }
  0x29   :  { %v166_v56 = vadd.f32 %v165_v54, %v164_v52 }
  0x2a   :  { %v146_v55 = vrot.slane %v145_v53, 2 }
  0x2b   :  { %v167_v58 = vrot.slane %v166_v56, 2 }
  0x2c   :  { %v147_v57 = vadd.f32 %v146_v55, %v145_v53 }
  0x2d   :  { %v168_v60 = vadd.f32 %v167_v58, %v166_v56 }
  0x2e   :  { %v148_v59 = vrot.slane %v147_v57, 1 }
  0x2f   :  { %v169_v62 = vrot.slane %v168_v60, 1 }
  0x30   :  { %v149_v61 = vadd.f32 %v148_v59, %v147_v57 }
  0x31   :  { %v170_v63 = vadd.f32 %v169_v62, %v168_v60 }
  0x33   :  { %v182_v0 = vsel %vm181_vm2, %v170_v63, %v149_v61 }
  0x34   :  { %246 = vmatmul.msk.f32.vlgmr.msra.gmra.mxu0 %vm128_vm1, %v182_v0 }
  0xb1   :  { %v202_v2 = vpop.f32.mrf.mxu0 }
  0xb2   :  { %v203_v3 = vadd.f32 %v251_v1, %v202_v2 }
  0xb4   :  { %v247_v4 = vmul.f32 -1.442695, %v203_v3 }
  0xb6   :  { %252 = vpow2.f32 %v247_v4 }
  0xbc   :  { %v253_v5 = vpop.eup %252 }
  0xbd   :  { %v208_v6 = vadd.f32 1.0, %v253_v5 }
  0xbf   :  { %254 = vrcp.f32 %v208_v6  ;;  %v220_v10 = vand.u32 2147483648, %v208_v6  ;;  %v218_v12 = vand.u32 2147483647, %v208_v6  ;;  %vm214_vm4 = vweird.f32 %v208_v6 }
  0xc1   :  { %v221_v14 = vor.u32 1.1754944e-38, %v220_v10  ;;  %vm219_vm7 = vcmp.eq.f32.partialorder %v218_v12, 8.507059e+37 }
  0xc5   :  { %v255_v7 = vpop.eup %254 }
  0xc6   :  { %v210_v8 = vmul.f32 %v255_v7, %v208_v6  ;;  %vm215_vm3 = vweird.f32 %v255_v7 }
  0xc7   :  { %vm216_vm5 = vmor %vm214_vm4, %vm215_vm3 }
  0xc8   :  { %v211_v9 = vsub.f32 1.0, %v210_v8 }
  0xca   :  { %v212_v11 = vmul.f32 %v255_v7, %v211_v9 }
  0xcc   :  { %v213_v13 = vadd.f32 %v255_v7, %v212_v11 }
  0xce   :  { %v217_v15 = vsel %vm216_vm5, %v255_v7, %v213_v13 }
  0xcf   :  { %v222_v16 = vsel %vm219_vm7, %v221_v14, %v217_v15 }
  0xd0   :  { %225 = vst.msk [vmem:[#allocation2] sm:$0x3] %vm224_vm6, %v222_v16 }
  0xd1   :  { %238 = dma.vmem_to_hbm [thread:$0]  %s234_s18, 32, %s236_s4, [#allocation3]  }
  0xd2   :  { %280 = dma.done.wait [#allocation3], 32  }
  0xd3   :  { %281 = vsyncadd [#allocation3], 4294967264 }
  0xd4   :  { %245 = vsyncpa [#allocation3], 1 }

</bundles_post_ra>
